<compile_context>
chip_gen: v6e
topology: v6e:2x2x1
jax: 0.10.0
libtpu: 0.0.40
codegen_flags: <defaults>
</compile_context>

<pallas_src>
import functools

import jax
import jax.numpy as jnp
from jax.experimental import pallas as pl
from jax.experimental.pallas import tpu as pltpu

_LANE = 128


# ----------------------------------------------------------------------------
# Pallas kernel: edge-aware smoothness partial sums for ONE batch element.
#
#   gradient_x(t) = t[:, :, :-1, :] - t[:, :, 1:, :]      (along H, torch's dim 2)
#   gradient_y(t) = t[:, :, :, :-1] - t[:, :, :, 1:]      (along W, torch's dim 3)
#   weights_x     = exp(-mean(|grad_x(img)|, channel, keepdim))
#   loss          = mean(|grad_x(pred)| * wx) + mean(|grad_y(pred)| * wy)
#
# The kernel emits per-batch lane-wise partial sums (B, 1, 1, Wpad) for the x
# and y terms; the final cross-lane reduce and the division by the true element
# counts happen in plain JAX.  Grid is (B,) and fully parallel.
# ----------------------------------------------------------------------------
def _edge_smooth_kernel(img_ref, pred_ref, outx_ref, outy_ref, *, true_w):
    img = img_ref[...].astype(jnp.float32)    # (1, C, H, Wpad)
    pred = pred_ref[...].astype(jnp.float32)  # (1, 1, H, Wpad)
    _, _, H, Wp = img.shape

    # Full-tile roll-based gradients: every op stays on aligned (H, Wpad) tiles;
    # the wrapped row/column and the padded lanes are removed by the masks below.
    igx = img - jnp.roll(img, -1, axis=2)     # valid for rows h < H-1
    pgx = pred - jnp.roll(pred, -1, axis=2)
    igy = img - jnp.roll(img, -1, axis=3)     # valid for cols w < true_w-1
    pgy = pred - jnp.roll(pred, -1, axis=3)

    row = jax.lax.broadcasted_iota(jnp.int32, (1, 1, H, Wp), 2)
    col = jax.lax.broadcasted_iota(jnp.int32, (1, 1, H, Wp), 3)
    mask_x = (row < (H - 1)) & (col < true_w)
    mask_y = col < (true_w - 1)

    # exp sits on the EUP slot; abs/mean/mul/select stay on the VPU.
    wx = jnp.exp(-jnp.mean(jnp.abs(igx), axis=1, keepdims=True))  # (1,1,H,Wp)
    wy = jnp.exp(-jnp.mean(jnp.abs(igy), axis=1, keepdims=True))  # (1,1,H,Wp)

    sx = jnp.where(mask_x, jnp.abs(pgx) * wx, 0.0)
    sy = jnp.where(mask_y, jnp.abs(pgy) * wy, 0.0)

    # Lane-dense partial sums (reduce over H only); finish in JAX.
    outx_ref[...] = jnp.sum(sx, axis=2, keepdims=True)  # (1,1,1,Wp)
    outy_ref[...] = jnp.sum(sy, axis=2, keepdims=True)  # (1,1,1,Wp)


def _edge_smooth_one_scale(pred, img):
    """pred: (B, 1, H, W) f32, img: (B, C, H, W) f32 -> scalar f32."""
    B, C, H, W = img.shape
    Bp, Cp, Hp, Wp_ = pred.shape
    assert (B, H, W) == (Bp, Hp, Wp_) and Cp == 1
    assert H >= 2 and W >= 2

    # Lane-dense layout: pad W to a multiple of 128; padded lanes masked in-kernel.
    Wpad = ((W + _LANE - 1) // _LANE) * _LANE
    if Wpad != W:
        pad = ((0, 0), (0, 0), (0, 0), (0, Wpad - W))
        img_p = jnp.pad(img, pad)
        pred_p = jnp.pad(pred, pad)
    else:
        img_p, pred_p = img, pred

    kernel = functools.partial(_edge_smooth_kernel, true_w=W)

    cost = pl.CostEstimate(
        flops=int(12 * B * (C + 1) * H * Wpad),
        transcendentals=int(2 * B * H * Wpad),
        bytes_accessed=int(4 * B * (C + 1) * H * Wpad + 2 * 4 * B * Wpad),
    )

    sum_x, sum_y = pl.pallas_call(
        kernel,
        out_shape=(
            jax.ShapeDtypeStruct((B, 1, 1, Wpad), jnp.float32),
            jax.ShapeDtypeStruct((B, 1, 1, Wpad), jnp.float32),
        ),
        grid_spec=pltpu.PrefetchScalarGridSpec(
            num_scalar_prefetch=0,
            grid=(B,),
            in_specs=[
                pl.BlockSpec((1, C, H, Wpad), lambda b: (b, 0, 0, 0)),
                pl.BlockSpec((1, 1, H, Wpad), lambda b: (b, 0, 0, 0)),
            ],
            out_specs=(
                pl.BlockSpec((1, 1, 1, Wpad), lambda b: (b, 0, 0, 0)),
                pl.BlockSpec((1, 1, 1, Wpad), lambda b: (b, 0, 0, 0)),
            ),
        ),
        compiler_params=pltpu.CompilerParams(
            dimension_semantics=("parallel",),  # per-batch outputs, no accumulation
        ),
        cost_estimate=cost,
    )(img_p, pred_p)

    # Divisors use the TRUE (unpadded) element counts of smoothness_x / smoothness_y.
    cnt_x = float(B * (H - 1) * W)
    cnt_y = float(B * H * (W - 1))
    return jnp.sum(sum_x) / cnt_x + jnp.sum(sum_y) / cnt_y


# ----------------------------------------------------------------------------
# Glue (plain JAX): adaptive average pool + multi-scale loop.
# ----------------------------------------------------------------------------
def _adaptive_avg_pool2d(img, out_hw):
    B, C, H, W = img.shape
    h, w = out_hw
    if (h, w) == (H, W):
        return img
    assert H % h == 0 and W % w == 0, "only integer-ratio adaptive pooling supported"
    return img.reshape(B, C, h, H // h, w, W // w).mean(axis=(3, 5))


def edge_aware_smoothness_loss(pred_disp, img, max_scales):
    loss = jnp.float32(0.0)
    weight = 1.0
    s = 0
    for scaled_disp in pred_disp:
        s += 1
        if s > max_scales:
            break
        _, _, h, w = scaled_disp.shape
        scaled_img = _adaptive_avg_pool2d(img, (h, w))
        loss = loss + _edge_smooth_one_scale(scaled_disp, scaled_img) * weight
        weight /= 4.0
    return loss


def compute_smooth_loss(tgt_depth, tgt_img, ref_depth, ref_img, max_scales=1):
    # NOTE: the original PyTorch code computes the tgt-pair loss and then
    # OVERWRITES it with the ref-pair loss, so only the ref pair contributes.
    # We keep those return semantics but skip the dead tgt-pair kernel launch.
    del tgt_depth, tgt_img
    return edge_aware_smoothness_loss(ref_depth, ref_img, max_scales)


# ----------------------------------------------------------------------------
# Pure-JAX reference (for correctness check only).
# ----------------------------------------------------------------------------
def _ref_edge_smooth_one_scale(pred, img):
    igx = img[:, :, :-1, :] - img[:, :, 1:, :]
    pgx = pred[:, :, :-1, :] - pred[:, :, 1:, :]
    igy = img[:, :, :, :-1] - img[:, :, :, 1:]
    pgy = pred[:, :, :, :-1] - pred[:, :, :, 1:]
    wx = jnp.exp(-jnp.mean(jnp.abs(igx), axis=1, keepdims=True))
    wy = jnp.exp(-jnp.mean(jnp.abs(igy), axis=1, keepdims=True))
    return jnp.mean(jnp.abs(pgx) * wx) + jnp.mean(jnp.abs(pgy) * wy)


def _ref_compute_smooth_loss(tgt_depth, tgt_img, ref_depth, ref_img):
    # Same overwrite semantics: only the ref pair contributes.
    return _ref_edge_smooth_one_scale(ref_depth[0], ref_img)


if __name__ == "__main__":
    key = jax.random.PRNGKey(0)
    k1, k2, k3, k4 = jax.random.split(key, 4)

    B, C, H, W = 2, 3, 16, 32
    img1 = jax.random.uniform(k1, (B, C, H, W), dtype=jnp.float32)
    img2 = jax.random.uniform(k2, (B, C, H, W), dtype=jnp.float32)
    # deterministic synthetic "depths" (positive), shaped like depth_net scale-1 output
    depth1 = 1.0 + jax.random.uniform(k3, (B, 1, H, W), dtype=jnp.float32) * 10.0
    depth2 = 1.0 + jax.random.uniform(k4, (B, 1, H, W), dtype=jnp.float32) * 10.0

    loss_2 = compute_smooth_loss([depth1], img1, [depth2], img2, max_scales=1)
    loss_2 = jax.block_until_ready(loss_2)

    ref = _ref_compute_smooth_loss([depth1], img1, [depth2], img2)
    ref = jax.block_until_ready(ref)
    assert jnp.allclose(loss_2, ref, rtol=1e-5, atol=1e-6), (loss_2, ref)

    # loss_pack entries that forward() fills with zeros / this loss.
    loss_pack = {
        "depth_smooth_loss": loss_2,
        "pt_depth_loss": jnp.zeros([2], jnp.float32),
        "geo_loss": jnp.zeros([2], jnp.float32),
        # TODO(synk): 'pj_depth_loss' / 'flow_error' require inverse_warp2, SSIM and
        #             the flow / pose / depth sub-networks, which are not defined in
        #             the provided module.
    }
    jax.block_until_ready(loss_pack["depth_smooth_loss"])

    print("KERNEL_OK")
</pallas_src>

<mosaic_0001>
module attributes {stable_mosaic.version = 11 : i64} {
  func.func @_edge_smooth_kernel(%arg0: i32, %arg1: memref<1x3x16x128xf32, #tpu.memory_space<vmem>>, %arg2: memref<1x1x16x128xf32, #tpu.memory_space<vmem>>, %arg3: memref<1x1x1x128xf32, #tpu.memory_space<vmem>>, %arg4: memref<1x1x1x128xf32, #tpu.memory_space<vmem>>) attributes {dimension_semantics = [#tpu.dimension_semantics<parallel>], iteration_bounds = array<i64: 2>, scalar_prefetch = 0 : i64, scratch_operands = 0 : i64, tpu.core_type = #tpu.core_type<tc>, window_params = [{transform_indices = @transform_0, window_bounds = array<i64: 1, 3, 16, 128>}, {transform_indices = @transform_1, window_bounds = array<i64: 1, 1, 16, 128>}, {transform_indices = @transform_2, window_bounds = array<i64: 1, 1, 1, 128>}, {transform_indices = @transform_3, window_bounds = array<i64: 1, 1, 1, 128>}]} {
    %c0 = arith.constant 0 : index
    %c0_0 = arith.constant 0 : index
    %c0_1 = arith.constant 0 : index
    %c0_2 = arith.constant 0 : index
    %0 = vector.load %arg1[%c0, %c0_0, %c0_1, %c0_2] : memref<1x3x16x128xf32, #tpu.memory_space<vmem>>, vector<1x3x16x128xf32>
    %c0_3 = arith.constant 0 : index
    %c0_4 = arith.constant 0 : index
    %c0_5 = arith.constant 0 : index
    %c0_6 = arith.constant 0 : index
    %1 = vector.load %arg2[%c0_3, %c0_4, %c0_5, %c0_6] : memref<1x1x16x128xf32, #tpu.memory_space<vmem>>, vector<1x1x16x128xf32>
    %2 = vector.extract_strided_slice %0 {offsets = [0, 0, 1, 0], sizes = [1, 3, 15, 128], strides = [1, 1, 1, 1]} : vector<1x3x16x128xf32> to vector<1x3x15x128xf32>
    %3 = vector.extract_strided_slice %0 {offsets = [0, 0, 0, 0], sizes = [1, 3, 1, 128], strides = [1, 1, 1, 1]} : vector<1x3x16x128xf32> to vector<1x3x1x128xf32>
    %4 = tpu.concatenate %2, %3 in 2 : vector<1x3x15x128xf32>, vector<1x3x1x128xf32> -> vector<1x3x16x128xf32>
    %5 = arith.subf %0, %4 : vector<1x3x16x128xf32>
    %6 = vector.extract_strided_slice %1 {offsets = [0, 0, 1, 0], sizes = [1, 1, 15, 128], strides = [1, 1, 1, 1]} : vector<1x1x16x128xf32> to vector<1x1x15x128xf32>
    %7 = vector.extract_strided_slice %1 {offsets = [0, 0, 0, 0], sizes = [1, 1, 1, 128], strides = [1, 1, 1, 1]} : vector<1x1x16x128xf32> to vector<1x1x1x128xf32>
    %8 = tpu.concatenate %6, %7 in 2 : vector<1x1x15x128xf32>, vector<1x1x1x128xf32> -> vector<1x1x16x128xf32>
    %9 = arith.subf %1, %8 : vector<1x1x16x128xf32>
    %10 = vector.extract_strided_slice %0 {offsets = [0, 0, 0, 1], sizes = [1, 3, 16, 127], strides = [1, 1, 1, 1]} : vector<1x3x16x128xf32> to vector<1x3x16x127xf32>
    %11 = vector.extract_strided_slice %0 {offsets = [0, 0, 0, 0], sizes = [1, 3, 16, 1], strides = [1, 1, 1, 1]} : vector<1x3x16x128xf32> to vector<1x3x16x1xf32>
    %12 = tpu.concatenate %10, %11 in 3 : vector<1x3x16x127xf32>, vector<1x3x16x1xf32> -> vector<1x3x16x128xf32>
    %13 = arith.subf %0, %12 : vector<1x3x16x128xf32>
    %14 = vector.extract_strided_slice %1 {offsets = [0, 0, 0, 1], sizes = [1, 1, 16, 127], strides = [1, 1, 1, 1]} : vector<1x1x16x128xf32> to vector<1x1x16x127xf32>
    %15 = vector.extract_strided_slice %1 {offsets = [0, 0, 0, 0], sizes = [1, 1, 16, 1], strides = [1, 1, 1, 1]} : vector<1x1x16x128xf32> to vector<1x1x16x1xf32>
    %16 = tpu.concatenate %14, %15 in 3 : vector<1x1x16x127xf32>, vector<1x1x16x1xf32> -> vector<1x1x16x128xf32>
    %17 = arith.subf %1, %16 : vector<1x1x16x128xf32>
    %18 = tpu.iota {dimensions = array<i32: 2>} : vector<1x1x16x128xi32>
    %19 = tpu.iota {dimensions = array<i32: 3>} : vector<1x1x16x128xi32>
    %c15_i32 = arith.constant 15 : i32
    %20 = vector.broadcast %c15_i32 : i32 to vector<1x1x16x128xi32>
    %21 = arith.cmpi slt, %18, %20 : vector<1x1x16x128xi32>
    %c32_i32 = arith.constant 32 : i32
    %22 = vector.broadcast %c32_i32 : i32 to vector<1x1x16x128xi32>
    %23 = arith.cmpi slt, %19, %22 : vector<1x1x16x128xi32>
    %24 = arith.andi %21, %23 : vector<1x1x16x128xi1>
    %c31_i32 = arith.constant 31 : i32
    %25 = vector.broadcast %c31_i32 : i32 to vector<1x1x16x128xi32>
    %26 = arith.cmpi slt, %19, %25 : vector<1x1x16x128xi32>
    %27 = math.absf %5 : vector<1x3x16x128xf32>
    %cst = arith.constant dense<0.000000e+00> : vector<1x16x128xf32>
    %28 = vector.multi_reduction <add>, %27, %cst [1] : vector<1x3x16x128xf32> to vector<1x16x128xf32>
    %29 = vector.shape_cast %28 : vector<1x16x128xf32> to vector<1x1x16x128xf32>
    %cst_7 = arith.constant 3.000000e+00 : f32
    %30 = vector.broadcast %cst_7 : f32 to vector<1x1x16x128xf32>
    %31 = arith.divf %29, %30 : vector<1x1x16x128xf32>
    %cst_8 = arith.constant 0.000000e+00 : f32
    %32 = vector.broadcast %cst_8 : f32 to vector<1x1x16x128xf32>
    %33 = arith.subf %32, %31 : vector<1x1x16x128xf32>
    %34 = math.exp %33 : vector<1x1x16x128xf32>
    %35 = math.absf %13 : vector<1x3x16x128xf32>
    %cst_9 = arith.constant dense<0.000000e+00> : vector<1x16x128xf32>
    %36 = vector.multi_reduction <add>, %35, %cst_9 [1] : vector<1x3x16x128xf32> to vector<1x16x128xf32>
    %37 = vector.shape_cast %36 : vector<1x16x128xf32> to vector<1x1x16x128xf32>
    %cst_10 = arith.constant 3.000000e+00 : f32
    %38 = vector.broadcast %cst_10 : f32 to vector<1x1x16x128xf32>
    %39 = arith.divf %37, %38 : vector<1x1x16x128xf32>
    %cst_11 = arith.constant 0.000000e+00 : f32
    %40 = vector.broadcast %cst_11 : f32 to vector<1x1x16x128xf32>
    %41 = arith.subf %40, %39 : vector<1x1x16x128xf32>
    %42 = math.exp %41 : vector<1x1x16x128xf32>
    %43 = math.absf %9 : vector<1x1x16x128xf32>
    %44 = arith.mulf %43, %34 : vector<1x1x16x128xf32>
    %cst_12 = arith.constant 0.000000e+00 : f32
    %45 = vector.broadcast %cst_12 : f32 to vector<1x1x16x128xf32>
    %46 = arith.select %24, %44, %45 : vector<1x1x16x128xi1>, vector<1x1x16x128xf32>
    %47 = math.absf %17 : vector<1x1x16x128xf32>
    %48 = arith.mulf %47, %42 : vector<1x1x16x128xf32>
    %cst_13 = arith.constant 0.000000e+00 : f32
    %49 = vector.broadcast %cst_13 : f32 to vector<1x1x16x128xf32>
    %50 = arith.select %26, %48, %49 : vector<1x1x16x128xi1>, vector<1x1x16x128xf32>
    %cst_14 = arith.constant dense<0.000000e+00> : vector<1x1x128xf32>
    %51 = vector.multi_reduction <add>, %46, %cst_14 [2] : vector<1x1x16x128xf32> to vector<1x1x128xf32>
    %52 = vector.shape_cast %51 : vector<1x1x128xf32> to vector<1x1x1x128xf32>
    %c0_15 = arith.constant 0 : index
    %c0_16 = arith.constant 0 : index
    %c0_17 = arith.constant 0 : index
    %c0_18 = arith.constant 0 : index
    %53 = vector.load %arg3[%c0_15, %c0_16, %c0_17, %c0_18] : memref<1x1x1x128xf32, #tpu.memory_space<vmem>>, vector<1x1x1x128xf32>
    tpu.vector_store %arg3[%c0_15, %c0_16, %c0_17, %c0_18], %52 {strides = array<i32>} : memref<1x1x1x128xf32, #tpu.memory_space<vmem>>, vector<1x1x1x128xf32>,
    %cst_19 = arith.constant dense<0.000000e+00> : vector<1x1x128xf32>
    %54 = vector.multi_reduction <add>, %50, %cst_19 [2] : vector<1x1x16x128xf32> to vector<1x1x128xf32>
    %55 = vector.shape_cast %54 : vector<1x1x128xf32> to vector<1x1x1x128xf32>
    %c0_20 = arith.constant 0 : index
    %c0_21 = arith.constant 0 : index
    %c0_22 = arith.constant 0 : index
    %c0_23 = arith.constant 0 : index
    %56 = vector.load %arg4[%c0_20, %c0_21, %c0_22, %c0_23] : memref<1x1x1x128xf32, #tpu.memory_space<vmem>>, vector<1x1x1x128xf32>
    tpu.vector_store %arg4[%c0_20, %c0_21, %c0_22, %c0_23], %55 {strides = array<i32>} : memref<1x1x1x128xf32, #tpu.memory_space<vmem>>, vector<1x1x1x128xf32>,
    return
  }
  func.func @transform_0(%arg0: i32) -> (i32, i32, i32, i32) {
    %c0_i32 = arith.constant 0 : i32
    %c0_i32_0 = arith.constant 0 : i32
    %c0_i32_1 = arith.constant 0 : i32
    %c0_i32_2 = arith.constant 0 : i32
    return %arg0, %c0_i32, %c0_i32_0, %c0_i32_1 : i32, i32, i32, i32
  }
  func.func @transform_1(%arg0: i32) -> (i32, i32, i32, i32) {
    %c0_i32 = arith.constant 0 : i32
    %c0_i32_0 = arith.constant 0 : i32
    %c0_i32_1 = arith.constant 0 : i32
    %c0_i32_2 = arith.constant 0 : i32
    return %arg0, %c0_i32, %c0_i32_0, %c0_i32_1 : i32, i32, i32, i32
  }
  func.func @transform_2(%arg0: i32) -> (i32, i32, i32, i32) {
    %c0_i32 = arith.constant 0 : i32
    %c0_i32_0 = arith.constant 0 : i32
    %c0_i32_1 = arith.constant 0 : i32
    %c0_i32_2 = arith.constant 0 : i32
    return %arg0, %c0_i32, %c0_i32_0, %c0_i32_1 : i32, i32, i32, i32
  }
  func.func @transform_3(%arg0: i32) -> (i32, i32, i32, i32) {
    %c0_i32 = arith.constant 0 : i32
    %c0_i32_0 = arith.constant 0 : i32
    %c0_i32_1 = arith.constant 0 : i32
    %c0_i32_2 = arith.constant 0 : i32
    return %arg0, %c0_i32, %c0_i32_0, %c0_i32_1 : i32, i32, i32, i32
  }
}

</mosaic_0001>

<bundles_post_ra>
// kernel: tpu_custom_call.1
= control target key start
LH: loop header
LB: loop body
LE: loop exit
PB: predicated region body
PF: predicated region fallthrough
CT: control target
= control target key end

     0   :  { %9 = vsyncpa [#allocation3], 0  ;;  %s1100_s0 = inlined_call_operand.hbm [shape: f32[2,3,16,128], index: 0, kind: input, shape index: {}]   ;;  %s1101_s1 = inlined_call_operand.hbm [shape: f32[2,1,16,128], index: 1, kind: input, shape index: {}]   ;;  %s1102_s2 = inlined_call_operand.hbm [shape: f32[2,1,1,128], index: 2, kind: output, shape index: {0}]   ;;  %s1103_s3 = inlined_call_operand.hbm [shape: f32[2,1,1,128], index: 3, kind: output, shape index: {1}]  }
   0x1   :  { %11 = vsyncpa [#allocation3 + $0x1], 0 }
   0x2   :  { %12 = vsyncpa [#allocation6], 0 }
   0x3   :  { %14 = vsyncpa [#allocation6 + $0x1], 0 }
   0x4   :  { %15 = vsyncpa [#allocation4], 0 }
   0x5   :  { %17 = vsyncpa [#allocation4 + $0x1], 0 }
   0x6   :  { %18 = vsyncpa [#allocation9], 0 }
   0x7   :  { %20 = vsyncpa [#allocation9 + $0x1], 0  ;;  %s813_s12 = smov 0   ;;  %s815_s13 = smov 0  }
   0x8   :  { %s817_s14 = smov 0   ;;  %s819_s15 = smov 0  }
   0x9 LB: > { %s834_s16 = sadd.s32 4294967295, %s784_s15   ;;  %s546_s17 = sadd.s32 4294967294, %s784_s15   ;;  %s784_s15 = sphi %s819_s15, %s1118_s15   ;;  %s780_s14 = sphi %s817_s14, %s1117_s14   ;;  %s776_s13 = sphi %s815_s13, %s1116_s13   ;;  %s772_s12 = sphi %s813_s12, %s1115_s12  }
   0xa   : > { %s838_s18 = sadd.s32 1, %s784_s15   ;;  %s33_s19 = sadd.s32 1, %s780_s14 }
   0xb   : > { %s30_s20 = ssub.s32 %s784_s15, %s838_s18  ;;  %p40_p0 = scmp.ne.s32.totalorder %s780_s14, %s776_s13 }
   0xc   : > { %p31_p1 = scmp.eq.s32.totalorder %s30_s20, 0  ;;  %p41_p2 = scmp.eq.s32.totalorder %s784_s15, 0 }
   0xd   : > { %p46_p3 = scmp.ne.s32.totalorder %s776_s13, %s772_s12  ;;  %p47_p4 = scmp.eq.s32.totalorder %s834_s16, 0 }
   0xe   : > { %s850_s21 = scalar_select %p31_p1, %s780_s14, %s33_s19  }
   0xf   : > { %p42_p5 = por %p41_p2, %p40_p0  ;;  %p852_p6 = por %p47_p4, %p46_p3 }
  0x10   : > { %p96_p7 = scmp.eq.s32.totalorder %s834_s16, 1  ;;  %p102_p8 = scmp.eq.s32.totalorder %s546_s17, 1 }
  0x11   : > { %s1106_s22 = scalar_select %p852_p6, 1, 0 }
  0x12   : > { %p585_p10 = scmp.lt.s32.totalorder %s784_s15, 2  ;;  %p859_p11 = por %p96_p7, %p40_p0 }
  0x13   : > { %p863_p12 = por %p102_p8, %p46_p3  ;;  %s868_s25 = sand.u32 1, %s780_s14  }
  0x14   : > { %s1107_s23 = scalar_select %p859_p11, 1, 0 }
  0x15   : > { %s1108_s24 = scalar_select %p863_p12, 1, 0 }
  0x16   : > { %s561_s26 = smul.u32 768, %s784_s15  ;;  %p877_p13 = pnand %p585_p10, %p42_p5 }
  0x17   : > { %s560_s27 = smul.u32 48, %s868_s25  ;;  %s149_s7 = scalar_lea.sflag [#allocation3], %s868_s25 }
  0x18   : > { %s875_s30 = scalar_lea.hbm %s1100_s0, %s561_s26  ;;  %p632_p1 = pneg %p877_p13 }
  0x19   : > { %s152_s5 = scalar_lea.vmem [#allocation2], %s560_s27  ;;  %s630_s8 = scalar_lea.hbm %s875_s30, 768 }
  0x1a   : > { %s159_s6 = sshll.u32 %s152_s5, 4  ;;  %p631_p0 = scmp.ne.s32.totalorder %s875_s30, %s630_s8  ;;  %s881_s6 = int_to_ptr.vmem [resolvable:$true] %s159_s6 }
  0x1b   : > { %s635_s11 = scalar_lea.hbm %s1100_s0, 1536  ;;  %p636_p4 = scmp.lt.s32.totalorder %s875_s30, %s1100_s0 }
  0x1c   : > { %p633_p2 = pnand %p632_p1, %p631_p0  ;;  %p637_p5 = scmp.lt.s32.totalorder %s635_s11, %s630_s8 }
  0x1e   : > { %p634_p3 = pneg %p633_p2  ;;  %p638_p7 = por %p637_p5, %p636_p4 }
  0x20   : > { %p639_p8 = pnand %p638_p7, %p634_p3 }
  0x22   : > { %642 = shalt.err (!%p639_p8)
}
  0x23   : > { %s643_s20 = scalar_lea.vmem %s881_s6, 768  ;;  %s786_s26 = smov [#allocation2]  }
  0x24   : > { %p644_p10 = scmp.ne.s32.totalorder %s881_s6, %s643_s20  ;;  %s648_s27 = sshll.u32 %s786_s26, 4  ;;  %s649_s27 = int_to_ptr.vmem [resolvable:$false] %s648_s27 }
  0x25   : > { %s650_s28 = scalar_lea.vmem %s649_s27, 1536  ;;  %p651_p9 = scmp.lt.s32.totalorder %s881_s6, %s649_s27 }
  0x26   : > { %p646_p0 = pnand %p644_p10, %p632_p1  ;;  %p652_p12 = scmp.lt.s32.totalorder %s650_s28, %s643_s20 }
  0x28   : > { %p647_p2 = pneg %p646_p0  ;;  %p653_p11 = por %p652_p12, %p651_p9 }
  0x2a   : > { %p654_p4 = pnand %p653_p11, %p647_p2 }
  0x2c   : > { %657 = shalt.err (!%p654_p4)
}
  0x2d   : > { %s787_s29 = smov 128   ;;  %s788_s5 = smov 8  }
  0x2e   : > { %574 = dma.hbm_to_vmem [thread:$0]  (!%p877_p13), %s875_s30, 768, %s881_s6, %s149_s7, %s787_s29, %s787_s29, %s788_s5  }
  0x2f   : > { %p553_p9 = scmp.ge.s32.totalorder %s784_s15, 1  ;;  %p188_p11 = scmp.lt.s32.totalorder %s784_s15, 3 }
  0x30   : > { %s550_s8 = sshll.u32 %s868_s25, 4  ;;  %s559_s10 = sshll.u32 %s784_s15, 8 }
  0x31   : > { %p916_p12 = pnand %p553_p9, %p188_p11  ;;  %s173_s11 = scalar_lea.vmem [#allocation5], %s550_s8 }
  0x32   : > { %s180_s17 = sshll.u32 %s173_s11, 4  ;;  %s924_s26 = scalar_lea.hbm %s1101_s1, %s559_s10  ;;  %s926_s17 = int_to_ptr.vmem [resolvable:$true] %s180_s17 }
  0x33   : > { %s170_s30 = scalar_lea.sflag [#allocation6], %s868_s25  ;;  %s658_s6 = scalar_lea.hbm %s924_s26, 256 }
  0x34   : > { %p659_p3 = scmp.ne.s32.totalorder %s924_s26, %s658_s6  ;;  %s663_s28 = scalar_lea.hbm %s1101_s1, 512 }
  0x35   : > { %p664_p8 = scmp.lt.s32.totalorder %s924_s26, %s1101_s1  ;;  %p665_p10 = scmp.lt.s32.totalorder %s663_s28, %s658_s6 }
  0x36   : > { %p661_p5 = pnand %p659_p3, %p632_p1 }
  0x37   : > { %p666_p0 = por %p665_p10, %p664_p8 }
  0x38   : > { %p662_p7 = pneg %p661_p5 }
  0x3a   : > { %p667_p2 = pnand %p666_p0, %p662_p7 }
  0x3c   : > { %670 = shalt.err (!%p667_p2)
}
  0x3d   : > { %s671_s25 = scalar_lea.vmem %s926_s17, 256  ;;  %s789_s10 = smov [#allocation5]  }
  0x3e   : > { %p672_p4 = scmp.ne.s32.totalorder %s926_s17, %s671_s25  ;;  %s676_s19 = sshll.u32 %s789_s10, 4  ;;  %s677_s19 = int_to_ptr.vmem [resolvable:$false] %s676_s19 }
  0x3f   : > { %s678_s20 = scalar_lea.vmem %s677_s19, 512  ;;  %p679_p3 = scmp.lt.s32.totalorder %s926_s17, %s677_s19 }
  0x40   : > { %p674_p9 = pnand %p672_p4, %p632_p1  ;;  %p680_p5 = scmp.lt.s32.totalorder %s678_s20, %s671_s25 }
  0x42   : > { %p675_p11 = pneg %p674_p9  ;;  %p681_p6 = por %p680_p5, %p679_p3 }
  0x44   : > { %p682_p8 = pnand %p681_p6, %p675_p11 }
  0x46   : > { %685 = shalt.err (!%p682_p8)
}
  0x47   : > { %577 = dma.hbm_to_vmem [thread:$0]  (!%p877_p13), %s924_s26, 256, %s926_s17, %s170_s30, %s787_s29, %s787_s29, %s788_s5  }
  0x48   : > { %192 = sbr.rel (%p916_p12) target bundleno = 262 (0x106), region = 28  ;;  %s957_s6 = sand.u32 (!%p916_p12), 1, %s776_s13  }
  0x49   : > { %s562_s7 = smul.u32 (!%p916_p12), 48, %s957_s6  ;;  %s195_s27 = scalar_lea.sflag (!%p916_p12), [#allocation3], %s957_s6 }
  0x4a   : > { %p1111_p6 = scmp.ne.s32.totalorder (!%p916_p12), %s1106_s22, 0 }
  0x4b   : > { %s198_s28 = scalar_lea.vmem (!%p916_p12), [#allocation2], %s562_s7 }
  0x4d   : > { %755 = dma.done.wait (%p1111_p6), %s195_s27, 768  }
  0x4e   : > { %757 = vsyncadd (%p1111_p6), %s195_s27, 4294966528  ;;  %s554_s4 = sshll.u32 %s957_s6, 4  ;;  %s204_s29 = scalar_lea.sflag [#allocation6], %s957_s6 }
  0x4f   : > { %s967_s5 = scalar_lea.vmem [#allocation5], %s554_s4 }
  0x50   : > { %759 = dma.done.wait (%p1111_p6), %s204_s29, 256  }
  0x51   : > { %761 = vsyncadd (%p1111_p6), %s204_s29, 4294967040  ;;  %v973_v0 = vld [vmem:[%s198_s28 + $0x10] sm:$0xff]  ;;  %v975_v1 = vld [vmem:[%s198_s28] sm:$0xff]  ;;  %vm252_vm0 = vcmask 1046528   ;;  %s790_s9 = smov 127   ;;  %v323_v44 = vlaneseq  ;;  %s555_s22 = sshll.u32 %s834_s16, 4 }
  0x52   : > { %v977_v2 = vld [vmem:[%s198_s28 + $0x18] sm:$0xff]  ;;  %295 = vrot.lane.b32.xlu1 %v973_v0, %s790_s9  ;;  %v256_v3 = vrot.slane %v973_v0, 1  ;;  %291 = vrot.lane.b32.xlu0 %v975_v1, %s790_s9  ;;  %v253_v4 = vrot.slane %v975_v1, 1  ;;  %v986_v6 = vld [vmem:[%s198_s28 + $0x8] sm:$0xff]  ;;  %s231_s17 = scalar_lea.vmem [#allocation7], %s957_s6  ;;  %s414_s11 = scalar_lea.hbm %s1102_s2, %s555_s22 }
  0x53   : > { %v257_v5 = vrot.slane %v977_v2, 1  ;;  %v988_v7 = vld [vmem:[%s198_s28 + $0x28] sm:$0xff]  ;;  %v254_v8 = vrot.slane %v986_v6, 1  ;;  %v992_v10 = vld [vmem:[%s198_s28 + $0x20] sm:$0xff]  ;;  %v324_v46 = vshrl.u32 %v323_v44, 7  ;;  %v1031_v51 = vand.u32 127, %v323_v44 }
  0x54   : > { %v260_v9 = vrot.slane %v988_v7, 1  ;;  %v259_v13 = vrot.slane %v992_v10, 1  ;;  %v1016_v32 = vld [vmem:[%s967_s5 + $0x8] sm:$0xff]  ;;  %v1019_v33 = vld [vmem:[%s967_s5] sm:$0xff]  ;;  %s416_s26 = sshll.u32 %s231_s17, 4  ;;  %s400_s25 = scalar_lea.sflag [#allocation4], %s957_s6  ;;  %s417_s26 = int_to_ptr.vmem [resolvable:$true] %s416_s26 }
  0x55   : > { %v258_v11 = vsel %vm252_vm0, %v256_v3, %v257_v5  ;;  %v272_v12 = vsel %vm252_vm0, %v257_v5, %v256_v3  ;;  %v255_v16 = vsel %vm252_vm0, %v253_v4, %v254_v8  ;;  %v271_v17 = vsel %vm252_vm0, %v254_v8, %v253_v4  ;;  %s686_s10 = scalar_lea.vmem %s417_s26, 16  ;;  %p1112_p1 = scmp.ne.s32.totalorder %s1107_s23, 0 }
  0x56   : > { %v276_v14 = vsub.f32 %v973_v0, %v258_v11  ;;  %v277_v15 = vsub.f32 %v977_v2, %v272_v12  ;;  %297 = vrot.lane.b32.xlu1 %v977_v2, %s790_s9  ;;  %293 = vrot.lane.b32.xlu0 %v986_v6, %s790_s9  ;;  %v274_v18 = vsub.f32 %v975_v1, %v255_v16  ;;  %v283_v42 = vrot.slane %v1016_v32, 1  ;;  %p687_p13 = scmp.ne.s32.totalorder %s417_s26, %s686_s10  ;;  %s791_s19 = smov [#allocation7]  }
  0x57   : > { %v275_v19 = vsub.f32 %v986_v6, %v271_v17  ;;  %v261_v20 = vsel %vm252_vm0, %v259_v13, %v260_v9  ;;  %v273_v23 = vsel %vm252_vm0, %v260_v9, %v259_v13  ;;  %v282_v43 = vrot.slane %v1019_v33, 1  ;;  %s690_s20 = sshll.u32 %s791_s19, 4  ;;  %s691_s20 = int_to_ptr.vmem [resolvable:$false] %s690_s20 }
  0x58   : > { %v336_v21 = vand.u32 2147483647, %v276_v14  ;;  %v337_v22 = vand.u32 2147483647, %v277_v15  ;;  %v278_v24 = vsub.f32 %v992_v10, %v261_v20  ;;  %v334_v25 = vand.u32 2147483647, %v274_v18  ;;  %p688_p12 = pnand %p687_p13, %p1112_p1  ;;  %p693_p10 = scmp.lt.s32.totalorder %s417_s26, %s691_s20 }
  0x59   : > { %v335_v26 = vand.u32 2147483647, %v275_v19  ;;  %v279_v27 = vsub.f32 %v988_v7, %v273_v23  ;;  %v284_v45 = vsel %vm252_vm0, %v282_v43, %v283_v42  ;;  %v288_v47 = vsel %vm252_vm0, %v283_v42, %v282_v43  ;;  %s692_s7 = scalar_lea.vmem %s691_s20, 32 }
  0x5a   : > { %v338_v28 = vand.u32 2147483647, %v278_v24  ;;  %301 = vrot.lane.b32.xlu1 %v988_v7, %s790_s9  ;;  %299 = vrot.lane.b32.xlu0 %v992_v10, %s790_s9  ;;  %v340_v31 = vadd.f32 %v336_v21, %v334_v25  ;;  %v289_v48 = vsub.f32 %v1019_v33, %v284_v45  ;;  %v290_v49 = vsub.f32 %v1016_v32, %v288_v47  ;;  %p689_p7 = pneg %p688_p12  ;;  %p694_p0 = scmp.lt.s32.totalorder %s692_s7, %s686_s10 }
  0x5b   : > { %v342_v29 = vadd.f32 %v337_v22, %v335_v26  ;;  %v339_v30 = vand.u32 2147483647, %v279_v27  ;;  %v325_v50 = vadd.s32 8, %v324_v46  ;;  %vm330_vm2 = vcmp.lt.s32.totalorder %v1031_v51, 32 }
  0x5c   : > { %v341_v34 = vadd.f32 %v340_v31, %v338_v28  ;;  %v371_v52 = vand.u32 2147483647, %v289_v48  ;;  %v372_v53 = vand.u32 2147483647, %v290_v49  ;;  %p695_p2 = por %p694_p0, %p693_p10 }
  0x5d   : > { %v343_v35 = vadd.f32 %v342_v29, %v339_v30  ;;  %vm329_vm1 = vcmp.lt.s32.totalorder %v325_v50, 15 }
  0x5e   : > { %v345_v36 = vmul.f32 0.33333334, %v341_v34  ;;  %317 = vrot.lane.b32.xlu1 %v1016_v32, %s790_s9  ;;  %315 = vrot.lane.b32.xlu0 %v1019_v33, %s790_s9  ;;  %vm332_vm3 = vmand %vm329_vm1, %vm330_vm2  ;;  %p696_p4 = pnand %p695_p2, %p689_p7 }
  0x5f   : > { %v346_v37 = vmul.f32 0.33333334, %v343_v35 }
  0x60   : > { %v347_v38 = vsub.f32 0.0, %v345_v36 }
  0x61   : > { %v348_v39 = vsub.f32 0.0, %v346_v37 }
  0x62   : > { %v349_v40 = vmul.f32 1.442695, %v347_v38 }
  0x63   : > { %v351_v41 = vmul.f32 1.442695, %v348_v39 }
  0x64   : > { %622 = vpow2.f32 %v349_v40 }
  0x65   : > { %624 = vpow2.f32 %v351_v41 }
  0x71   : > { %v623_v54 = vpop.eup %622 }
  0x72   : > { %v625_v55 = vpop.eup %624  ;;  %v373_v56 = vmul.f32 %v623_v54, %v371_v52 }
  0x73   : > { %v374_v57 = vmul.f32 %v625_v55, %v372_v53 }
  0x74   : > { %v375_v58 = vsel %vm330_vm2, %v373_v56, 0.0 }
  0x75   : > { %v376_v59 = vsel %vm332_vm3, %v374_v57, 0.0 }
  0x76   : > { %v383_v60 = vadd.f32 %v376_v59, %v375_v58 }
  0x78   : > { %v384_v61 = vrot.slane %v383_v60, 4 }
  0x7a   : > { %v385_v62 = vadd.f32 %v384_v61, %v383_v60 }
  0x7c   : > { %v386_v63 = vrot.slane %v385_v62, 2 }
  0x7e   : > { %v387_v3 = vadd.f32 %v386_v63, %v385_v62 }
  0x80   : > { %v388_v4 = vrot.slane %v387_v3, 1 }
  0x82   : > { %v389_v5 = vadd.f32 %v388_v4, %v387_v3 }
  0x84   : > { %390 = vst [vmem:[%s231_s17] sm:$0x1] %v389_v5 }
  0x85   : > { %699 = shalt.err (!%p696_p4)
}
  0x86   : > { %s700_s27 = scalar_lea.hbm %s414_s11, 16  ;;  %s704_s29 = scalar_lea.hbm %s1102_s2, 32 }
  0x87   : > { %p701_p9 = scmp.ne.s32.totalorder %s414_s11, %s700_s27  ;;  %p705_p5 = scmp.lt.s32.totalorder %s414_s11, %s1102_s2 }
  0x88   : > { %p706_p8 = scmp.lt.s32.totalorder %s704_s29, %s700_s27 }
  0x89   : > { %p702_p11 = pnand %p701_p9, %p1112_p1 }
  0x8a   : > { %p707_p6 = por %p706_p8, %p705_p5 }
  0x8b   : > { %p703_p3 = pneg %p702_p11 }
  0x8d   : > { %p708_p13 = pnand %p707_p6, %p703_p3 }
  0x8f   : > { %711 = shalt.err (!%p708_p13)
}
  0x90   : > { %567 = dma.vmem_to_hbm [thread:$0]  (%p1112_p1), %s417_s26, 16, %s414_s11, %s400_s25   ;;  %vm333_vm4 = vcmp.lt.s32.totalorder %v1031_v51, 31 }
  0x91   : > { %s237_s17 = scalar_lea.vmem [#allocation8], %s957_s6  ;;  %s427_s11 = scalar_lea.hbm %s1103_s3, %s555_s22 }
  0x92   : > { %s429_s26 = sshll.u32 %s237_s17, 4  ;;  %s404_s25 = scalar_lea.sflag [#allocation9], %s957_s6  ;;  %s430_s26 = int_to_ptr.vmem [resolvable:$true] %s429_s26 }
  0x93   : > { %s712_s10 = scalar_lea.vmem %s430_s26, 16  ;;  %s792_s19 = smov [#allocation8]  }
  0x94   : > { %p713_p12 = scmp.ne.s32.totalorder %s430_s26, %s712_s10  ;;  %s716_s20 = sshll.u32 %s792_s19, 4  ;;  %s717_s20 = int_to_ptr.vmem [resolvable:$false] %s716_s20 }
  0x95   : > { %s718_s7 = scalar_lea.vmem %s717_s20, 32  ;;  %p719_p0 = scmp.lt.s32.totalorder %s430_s26, %s717_s20 }
  0x96   : > { %p714_p7 = pnand %p713_p12, %p1112_p1  ;;  %p720_p2 = scmp.lt.s32.totalorder %s718_s7, %s712_s10 }
  0x98   : > { %p715_p10 = pneg %p714_p7  ;;  %p721_p4 = por %p720_p2, %p719_p0 }
  0x9a   : > { %p722_p9 = pnand %p721_p4, %p715_p10 }
  0xc4   : > { %v296_v8 = vpop.permute.xlu1 %295  ;;  %v292_v9 = vpop.permute.xlu0 %291 }
  0xc5   : > { %v311_v11 = vsub.f32 %v973_v0, %v296_v8  ;;  %v309_v12 = vsub.f32 %v975_v1, %v292_v9 }
  0xc7   : > { %v355_v17 = vand.u32 2147483647, %v311_v11  ;;  %v353_v18 = vand.u32 2147483647, %v309_v12 }
  0xc8   : > { %v298_v13 = vpop.permute.xlu1 %297  ;;  %v294_v14 = vpop.permute.xlu0 %293 }
  0xc9   : > { %v312_v15 = vsub.f32 %v977_v2, %v298_v13  ;;  %v310_v16 = vsub.f32 %v986_v6, %v294_v14  ;;  %v359_v25 = vadd.f32 %v355_v17, %v353_v18 }
  0xcb   : > { %v356_v19 = vand.u32 2147483647, %v312_v15  ;;  %v354_v20 = vand.u32 2147483647, %v310_v16 }
  0xcc   : > { %v302_v21 = vpop.permute.xlu1 %301  ;;  %v300_v22 = vpop.permute.xlu0 %299 }
  0xcd   : > { %v314_v23 = vsub.f32 %v988_v7, %v302_v21  ;;  %v313_v24 = vsub.f32 %v992_v10, %v300_v22  ;;  %v361_v0 = vadd.f32 %v356_v19, %v354_v20 }
  0xcf   : > { %v358_v26 = vand.u32 2147483647, %v314_v23  ;;  %v357_v1 = vand.u32 2147483647, %v313_v24 }
  0xd0   : > { %v318_v35 = vpop.permute.xlu1 %317  ;;  %v316_v36 = vpop.permute.xlu0 %315 }
  0xd1   : > { %v362_v27 = vadd.f32 %v361_v0, %v358_v26  ;;  %v360_v28 = vadd.f32 %v359_v25, %v357_v1  ;;  %v322_v7 = vsub.f32 %v1016_v32, %v318_v35  ;;  %v321_v10 = vsub.f32 %v1019_v33, %v316_v36 }
  0xd3   : > { %v364_v29 = vmul.f32 0.33333334, %v362_v27  ;;  %v363_v2 = vmul.f32 0.33333334, %v360_v28  ;;  %v378_v37 = vand.u32 2147483647, %v322_v7 }
  0xd4   : > { %v377_v38 = vand.u32 2147483647, %v321_v10 }
  0xd5   : > { %v366_v30 = vsub.f32 0.0, %v364_v29  ;;  %v365_v6 = vsub.f32 0.0, %v363_v2 }
  0xd7   : > { %v369_v31 = vmul.f32 1.442695, %v366_v30  ;;  %v367_v34 = vmul.f32 1.442695, %v365_v6 }
  0xd9   : > { %626 = vpow2.f32 %v369_v31 }
  0xda   : > { %628 = vpow2.f32 %v367_v34 }
  0xe6   : > { %v627_v39 = vpop.eup %626 }
  0xe7   : > { %v629_v40 = vpop.eup %628  ;;  %v380_v41 = vmul.f32 %v627_v39, %v378_v37 }
  0xe8   : > { %v379_v42 = vmul.f32 %v629_v40, %v377_v38 }
  0xe9   : > { %v382_v43 = vsel %vm333_vm4, %v380_v41, 0.0 }
  0xea   : > { %v381_v44 = vsel %vm333_vm4, %v379_v42, 0.0 }
  0xeb   : > { %v391_v45 = vadd.f32 %v382_v43, %v381_v44 }
  0xed   : > { %v392_v46 = vrot.slane %v391_v45, 4 }
  0xef   : > { %v393_v47 = vadd.f32 %v392_v46, %v391_v45 }
  0xf1   : > { %v394_v32 = vrot.slane %v393_v47, 2 }
  0xf3   : > { %v395_v48 = vadd.f32 %v394_v32, %v393_v47 }
  0xf5   : > { %v396_v33 = vrot.slane %v395_v48, 1 }
  0xf7   : > { %v397_v49 = vadd.f32 %v396_v33, %v395_v48 }
  0xf9   : > { %398 = vst [vmem:[%s237_s17] sm:$0x1] %v397_v49 }
  0xfa   : > { %725 = shalt.err (!%p722_p9)
}
  0xfb   : > { %s726_s16 = scalar_lea.hbm %s427_s11, 16  ;;  %s730_s27 = scalar_lea.hbm %s1103_s3, 32 }
  0xfc   : > { %p727_p11 = scmp.ne.s32.totalorder %s427_s11, %s726_s16  ;;  %p731_p8 = scmp.lt.s32.totalorder %s427_s11, %s1103_s3 }
  0xfd   : > { %p732_p6 = scmp.lt.s32.totalorder %s730_s27, %s726_s16 }
  0xfe   : > { %p728_p3 = pnand %p727_p11, %p1112_p1 }
  0xff   : > { %p733_p13 = por %p732_p6, %p731_p8 }
 0x100   : > { %p729_p5 = pneg %p728_p3 }
 0x102   : > { %p734_p12 = pnand %p733_p13, %p729_p5 }
 0x104   : > { %737 = shalt.err (!%p734_p12)
}
 0x105   : > { %568 = dma.vmem_to_hbm [thread:$0]  (%p1112_p1), %s430_s26, 16, %s427_s11, %s404_s25  }
 0x106 PF: > { %s441_s29 = sand.u32 1, %s772_s12   ;;  %p1113_p7 = scmp.ne.s32.totalorder %s1108_s24, 0 }
 0x107   : > { %p1114_p10 = scmp.ge.s32.totalorder %s784_s15, 2  ;;  %s442_s5 = scalar_lea.sflag [#allocation4], %s441_s29 }
 0x109   : > { %p579_p0 = pnand %p1114_p10, %p1113_p7 }
 0x10b   : > { %p580_p2 = pneg %p579_p0 }
 0x10d   : > { %763 = dma.done.wait (%p580_p2), %s442_s5, 16  }
 0x10e   : > { %765 = vsyncadd (%p580_p2), %s442_s5, 4294967280  ;;  %s450_s9 = scalar_lea.sflag [#allocation9], %s441_s29 }
 0x10f   : > { %767 = dma.done.wait (%p580_p2), %s450_s9, 16  }
 0x110   : > { %769 = vsyncadd (%p580_p2), %s450_s9, 4294967280  ;;  %p23_p1 = scmp.ge.s32.totalorder %s838_s18, 4   ;;  %s1115_s12 = smov %s776_s13 }
 0x111   : > { %s1116_s13 = smov %s780_s14  ;;  %s1117_s14 = smov %s850_s21 }
 0x112   : > { %s1118_s15 = smov %s838_s18  ;;  %25 = sbr.rel (!%p23_p1) target bundleno = 9 (0x9), region = 103 }
 0x117   :  { %454 = vsyncpa [#allocation3], 1 }
 0x118   :  { %456 = vsyncpa [#allocation3 + $0x1], 1 }
 0x119   :  { %457 = vsyncpa [#allocation6], 1 }
 0x11a   :  { %459 = vsyncpa [#allocation6 + $0x1], 1 }
 0x11b   :  { %460 = vsyncpa [#allocation4], 1 }
 0x11c   :  { %462 = vsyncpa [#allocation4 + $0x1], 1 }
 0x11d   :  { %463 = vsyncpa [#allocation9], 1 }
 0x11e   :  { %465 = vsyncpa [#allocation9 + $0x1], 1 }

</bundles_post_ra>
